<compile_context>
chip_gen: v7x
topology: tpu7x:2x2x1
jax: 0.10.0
libtpu: 0.0.40
codegen_flags: <defaults>
</compile_context>

<pallas_src>
import functools

import jax
import jax.numpy as jnp
from jax.experimental import pallas as pl
from jax.experimental.pallas import tpu as pltpu


def _layer_norm(x, gamma, beta, eps=1e-5):
    mean = jnp.mean(x, axis=-1, keepdims=True)
    c = x - mean
    var = jnp.mean(c * c, axis=-1, keepdims=True)
    return c * jax.lax.rsqrt(var + eps) * gamma + beta


def _decoder_block_kernel(x_ref, enc_ref, wq_ref, wkv_ref,
                          ln1_g_ref, ln1_b_ref,
                          w1_ref, b1_ref, w2_ref, b2_ref,
                          ln2_g_ref, ln2_b_ref,
                          o_ref, k_scr, v_scr, *, n_heads):
    bt, tq, d = x_ref.shape
    _, nk, _ = enc_ref.shape
    hd = d // n_heads
    cdt = wq_ref.dtype        # MXU operand dtype (bf16 by default; f32 for the precision check)

    # ---- K/V projection: once per batch tile (q-tile axis is innermost / "arbitrary") ----
    @pl.when(pl.program_id(1) == 0)
    def _():
        enc2d = enc_ref[...].astype(cdt).reshape(bt * nk, d)
        kv = jnp.dot(enc2d, wkv_ref[...],
                     preferred_element_type=jnp.float32).reshape(bt, nk, 2 * d)
        k_scr[...] = kv[:, :, :d].astype(k_scr.dtype)
        v_scr[...] = kv[:, :, d:].astype(v_scr.dtype)

    x = x_ref[...]                                            # (bt, tq, d) f32

    # ---- Q projection on the collapsed (bt*tq, d) matrix; scale pre-folded into Wq ----
    q = jnp.dot(x.astype(cdt).reshape(bt * tq, d), wq_ref[...],
                preferred_element_type=jnp.float32).reshape(bt, tq, d)
    qc = q.astype(cdt)
    k = k_scr[...]                                            # (bt, nk, d) compute dtype
    v = v_scr[...]

    # ---- multi-head cross attention: per-head results kept in vregs, no VMEM scratch ----
    heads = []
    for h in range(n_heads):
        lo = h * hd
        s = jnp.einsum('bqd,bkd->bqk',
                       qc[:, :, lo:lo + hd], k[:, :, lo:lo + hd],
                       preferred_element_type=jnp.float32)
        s = s - jnp.max(s, axis=-1, keepdims=True)
        p = jnp.exp(s)
        p = p / jnp.sum(p, axis=-1, keepdims=True)            # exact reciprocal, f32 softmax
        heads.append(jnp.einsum('bqk,bkd->bqd',
                                p.astype(cdt), v[:, :, lo:lo + hd],
                                preferred_element_type=jnp.float32))
    o = jnp.concatenate(heads, axis=-1)                       # (bt, tq, d) f32

    # TODO(synk): dropout1 / dropout2 are identity (inference / eval mode only).
    out = _layer_norm(o + x, ln1_g_ref[...], ln1_b_ref[...])

    # ---- feed-forward on the collapsed (bt*tq, d) matrix ----
    h1 = jnp.dot(out.astype(cdt).reshape(bt * tq, d), w1_ref[...],
                 preferred_element_type=jnp.float32) + b1_ref[...]
    h1 = jnp.maximum(h1, 0.0)
    y = jnp.dot(h1.astype(cdt), w2_ref[...],
                preferred_element_type=jnp.float32) + b2_ref[...]
    y = y.reshape(bt, tq, d) + out
    o_ref[...] = _layer_norm(y, ln2_g_ref[...], ln2_b_ref[...]).astype(o_ref.dtype)


def _pick_batch_tile(B, block_b):
    # Keep at least 2 grid steps along the batch axis when B > 1 so megacore can shard it.
    cap = block_b if B == 1 else min(block_b, max(1, B // 2))
    bt = max(1, min(cap, B))
    while B % bt:
        bt -= 1
    return bt


def _pick_q_tile(Nq, target):
    if Nq <= target:
        return Nq
    for cand in range(min(target, Nq), 7, -1):        # divisor of Nq, multiple of 8
        if Nq % cand == 0 and cand % 8 == 0:
            return cand
    return Nq


def _vmem_limit_bytes(bt, tq, nk, d, c_bytes):
    f32 = 4
    weights = 2 * (11 * d * d) * c_bytes                   # Wq, [Wk|Wv], W1, W2 (double-buffered)
    acts = 2 * (2 * bt * tq * d + bt * nk * d) * f32       # input / output / encoder tiles
    kv_scr = 2 * bt * nk * d * c_bytes                     # persistent K/V scratch
    live = (bt * tq * 4 * d + 3 * bt * tq * nk + 4 * bt * tq * d) * f32   # h1, scores, q/o/out/y
    est = weights + acts + kv_scr + 2 * live + (1 << 20)
    cap = 100 * 1024 * 1024
    try:
        cap = min(cap, int(pltpu.get_tpu_info().vmem_capacity_bytes * 0.9))
    except Exception:
        pass
    return int(min(max(est, 32 * 1024 * 1024), cap))


def decoder_block(inputs, encoder_x, wq, wk, wv,
                  ln1_g, ln1_b, w1, b1, w2, b2, ln2_g, ln2_b,
                  *, n_heads, block_b=4, block_q=256, compute_dtype=jnp.bfloat16):
    """inputs: (B, Nq, D), encoder_x: (B, Nk, D); returns (B, Nq, D)."""
    B, Nq, D = inputs.shape
    _, Nk, _ = encoder_x.shape
    assert D % n_heads == 0
    hd = D // n_heads

    bt = _pick_batch_tile(B, block_b)
    tq = _pick_q_tile(Nq, block_q)
    c_bytes = jnp.dtype(compute_dtype).itemsize

    # Weight prep: fold attention scale into Wq, fuse K/V projections, pre-cast MXU weights.
    scale = 1.0 / (hd ** 0.5)
    wq_s = (wq * scale).astype(compute_dtype)
    wkv = jnp.concatenate([wk, wv], axis=1).astype(compute_dtype)
    w1_c = w1.astype(compute_dtype)
    w2_c = w2.astype(compute_dtype)
    ln1_g2, ln1_b2 = ln1_g.reshape(1, D), ln1_b.reshape(1, D)
    ln2_g2, ln2_b2 = ln2_g.reshape(1, D), ln2_b.reshape(1, D)
    b1_2, b2_2 = b1.reshape(1, 4 * D), b2.reshape(1, D)

    kernel = functools.partial(_decoder_block_kernel, n_heads=n_heads)
    const2d = lambda b, q: (0, 0)

    return pl.pallas_call(
        kernel,
        out_shape=jax.ShapeDtypeStruct((B, Nq, D), inputs.dtype),
        grid_spec=pltpu.PrefetchScalarGridSpec(
            num_scalar_prefetch=0,
            grid=(B // bt, Nq // tq),
            in_specs=[
                pl.BlockSpec((bt, tq, D), lambda b, q: (b, q, 0)),    # inputs
                pl.BlockSpec((bt, Nk, D), lambda b, q: (b, 0, 0)),    # encoder_x
                pl.BlockSpec((D, D), const2d),                        # Wq (pre-scaled)
                pl.BlockSpec((D, 2 * D), const2d),                    # [Wk | Wv]
                pl.BlockSpec((1, D), const2d),                        # ln1 gamma
                pl.BlockSpec((1, D), const2d),                        # ln1 beta
                pl.BlockSpec((D, 4 * D), const2d),                    # ff1 weight
                pl.BlockSpec((1, 4 * D), const2d),                    # ff1 bias
                pl.BlockSpec((4 * D, D), const2d),                    # ff2 weight
                pl.BlockSpec((1, D), const2d),                        # ff2 bias
                pl.BlockSpec((1, D), const2d),                        # ln2 gamma
                pl.BlockSpec((1, D), const2d),                        # ln2 beta
            ],
            out_specs=pl.BlockSpec((bt, tq, D), lambda b, q: (b, q, 0)),
            scratch_shapes=[pltpu.VMEM((bt, Nk, D), compute_dtype),   # K (persistent per batch tile)
                            pltpu.VMEM((bt, Nk, D), compute_dtype)],  # V
        ),
        compiler_params=pltpu.CompilerParams(
            dimension_semantics=("parallel", "arbitrary"),
            vmem_limit_bytes=_vmem_limit_bytes(bt, tq, Nk, D, c_bytes),
        ),
    )(inputs, encoder_x, wq_s, wkv, ln1_g2, ln1_b2, w1_c, b1_2, w2_c, b2_2, ln2_g2, ln2_b2)


# ----------------------------- reference & init -----------------------------

def xavier_uniform(key, shape):
    fan_out, fan_in = shape
    bound = (6.0 / (fan_in + fan_out)) ** 0.5
    return jax.random.uniform(key, shape, jnp.float32, minval=-bound, maxval=bound)


def decoder_block_ref(inputs, encoder_x, wq, wk, wv,
                      ln1_g, ln1_b, w1, b1, w2, b2, ln2_g, ln2_b, n_heads):
    q = inputs @ wq
    k = encoder_x @ wk
    v = encoder_x @ wv
    q_ = jnp.concatenate(jnp.split(q, n_heads, axis=-1), axis=0)
    k_ = jnp.concatenate(jnp.split(k, n_heads, axis=-1), axis=0)
    v_ = jnp.concatenate(jnp.split(v, n_heads, axis=-1), axis=0)
    a = q_ @ jnp.swapaxes(k_, -2, -1)
    a = a / (q_.shape[-1] ** 0.5)
    a = jax.nn.softmax(a, axis=-1)
    o = a @ v_
    o = jnp.concatenate(jnp.split(o, n_heads, axis=0), axis=-1)
    out = o + inputs
    out = _layer_norm(out, ln1_g, ln1_b)
    y = jax.nn.relu(out @ w1 + b1)
    y = y @ w2 + b2
    y = y + out
    return _layer_norm(y, ln2_g, ln2_b)


if __name__ == "__main__":
    B, Nq, Nk, D, H = 2, 8, 16, 32, 4   # batch, decoder seq, encoder seq, input_dim=output_dim, heads

    key = jax.random.PRNGKey(0)
    ks = jax.random.split(key, 8)
    inputs = jax.random.normal(ks[0], (B, Nq, D), jnp.float32)
    encoder_x = jax.random.normal(ks[1], (B, Nk, D), jnp.float32)

    wq = xavier_uniform(ks[2], (D, D))
    wk = xavier_uniform(ks[3], (D, D))
    wv = xavier_uniform(ks[4], (D, D))
    ln1_g = jnp.ones((D,), jnp.float32)
    ln1_b = jnp.zeros((D,), jnp.float32)
    ln2_g = jnp.ones((D,), jnp.float32)
    ln2_b = jnp.zeros((D,), jnp.float32)
    lim1 = 1.0 / (D ** 0.5)
    w1 = jax.random.uniform(ks[5], (D, 4 * D), jnp.float32, -lim1, lim1)
    b1 = jax.random.uniform(ks[6], (4 * D,), jnp.float32, -lim1, lim1)
    lim2 = 1.0 / ((4 * D) ** 0.5)
    w2 = jax.random.uniform(ks[7], (4 * D, D), jnp.float32, -lim2, lim2)
    b2 = jnp.zeros((D,), jnp.float32)

    args = (inputs, encoder_x, wq, wk, wv, ln1_g, ln1_b, w1, b1, w2, b2, ln2_g, ln2_b)
    ref = decoder_block_ref(*args, H)

    # Performance path: bf16 MXU operands, f32 accumulation / softmax / LayerNorm.
    out_bf16 = jax.block_until_ready(decoder_block(*args, n_heads=H))
    assert out_bf16.shape == (B, Nq, D), out_bf16.shape
    err_bf16 = float(jnp.max(jnp.abs(out_bf16 - ref)))
    assert jnp.allclose(out_bf16, ref, atol=1e-1, rtol=1e-1), \
        f"bf16-path mismatch vs reference, max_err={err_bf16}"

    # Precision check: same kernel with f32 MXU operands must match the reference tightly.
    out_f32 = jax.block_until_ready(decoder_block(*args, n_heads=H, compute_dtype=jnp.float32))
    err_f32 = float(jnp.max(jnp.abs(out_f32 - ref)))
    assert jnp.allclose(out_f32, ref, atol=2e-3, rtol=2e-3), \
        f"f32-path mismatch vs reference, max_err={err_f32}"

    print("KERNEL_OK")
</pallas_src>

<mosaic_0001>
module attributes {stable_mosaic.version = 11 : i64} {
  func.func @_decoder_block_kernel(%arg0: i32, %arg1: i32, %arg2: memref<1x8x32xf32, #tpu.memory_space<vmem>>, %arg3: memref<1x16x32xf32, #tpu.memory_space<vmem>>, %arg4: memref<32x32xbf16, #tpu.memory_space<vmem>>, %arg5: memref<32x64xbf16, #tpu.memory_space<vmem>>, %arg6: memref<1x32xf32, #tpu.memory_space<vmem>>, %arg7: memref<1x32xf32, #tpu.memory_space<vmem>>, %arg8: memref<32x128xbf16, #tpu.memory_space<vmem>>, %arg9: memref<1x128xf32, #tpu.memory_space<vmem>>, %arg10: memref<128x32xbf16, #tpu.memory_space<vmem>>, %arg11: memref<1x32xf32, #tpu.memory_space<vmem>>, %arg12: memref<1x32xf32, #tpu.memory_space<vmem>>, %arg13: memref<1x32xf32, #tpu.memory_space<vmem>>, %arg14: memref<1x8x32xf32, #tpu.memory_space<vmem>>, %arg15: memref<1x16x32xbf16, #tpu.memory_space<vmem>>, %arg16: memref<1x16x32xbf16, #tpu.memory_space<vmem>>) attributes {dimension_semantics = [#tpu.dimension_semantics<parallel>, #tpu.dimension_semantics<arbitrary>], iteration_bounds = array<i64: 2, 1>, scalar_prefetch = 0 : i64, scratch_operands = 2 : i64, tpu.core_type = #tpu.core_type<tc>, window_params = [{transform_indices = @transform_0, window_bounds = array<i64: 1, 8, 32>}, {transform_indices = @transform_1, window_bounds = array<i64: 1, 16, 32>}, {pipeline_mode = #tpu.pipeline_mode<synchronous>, transform_indices = @transform_2, window_bounds = array<i64: 32, 32>}, {pipeline_mode = #tpu.pipeline_mode<synchronous>, transform_indices = @transform_3, window_bounds = array<i64: 32, 64>}, {pipeline_mode = #tpu.pipeline_mode<synchronous>, transform_indices = @transform_4, window_bounds = array<i64: 1, 32>}, {pipeline_mode = #tpu.pipeline_mode<synchronous>, transform_indices = @transform_5, window_bounds = array<i64: 1, 32>}, {pipeline_mode = #tpu.pipeline_mode<synchronous>, transform_indices = @transform_6, window_bounds = array<i64: 32, 128>}, {pipeline_mode = #tpu.pipeline_mode<synchronous>, transform_indices = @transform_7, window_bounds = array<i64: 1, 128>}, {pipeline_mode = #tpu.pipeline_mode<synchronous>, transform_indices = @transform_8, window_bounds = array<i64: 128, 32>}, {pipeline_mode = #tpu.pipeline_mode<synchronous>, transform_indices = @transform_9, window_bounds = array<i64: 1, 32>}, {pipeline_mode = #tpu.pipeline_mode<synchronous>, transform_indices = @transform_10, window_bounds = array<i64: 1, 32>}, {pipeline_mode = #tpu.pipeline_mode<synchronous>, transform_indices = @transform_11, window_bounds = array<i64: 1, 32>}, {transform_indices = @transform_12, window_bounds = array<i64: 1, 8, 32>}]} {
    %c0_i32 = arith.constant 0 : i32
    %0 = arith.cmpi eq, %arg1, %c0_i32 : i32
    %1 = arith.extui %0 : i1 to i32
    %c0_i32_0 = arith.constant 0 : i32
    %2 = arith.cmpi ne, %1, %c0_i32_0 : i32
    scf.if %2 {
      %c0_59 = arith.constant 0 : index
      %c0_60 = arith.constant 0 : index
      %c0_61 = arith.constant 0 : index
      %140 = vector.load %arg3[%c0_59, %c0_60, %c0_61] : memref<1x16x32xf32, #tpu.memory_space<vmem>>, vector<1x16x32xf32>
      %141 = arith.truncf %140 : vector<1x16x32xf32> to vector<1x16x32xbf16>
      %142 = vector.shape_cast %141 : vector<1x16x32xbf16> to vector<16x32xbf16>
      %c0_62 = arith.constant 0 : index
      %c0_63 = arith.constant 0 : index
      %143 = vector.load %arg5[%c0_62, %c0_63] : memref<32x64xbf16, #tpu.memory_space<vmem>>, vector<32x64xbf16>
      %cst_64 = arith.constant dense<0.000000e+00> : vector<16x64xf32>
      %144 = tpu.matmul %142, %143, %cst_64 {dimension_numbers = #tpu.dot_dimension_numbers<[1], [0], [0], [1], [0, 0, 1, 1], [], []>} : vector<16x32xbf16>, vector<32x64xbf16>, vector<16x64xf32> -> vector<16x64xf32>
      %145 = vector.shape_cast %144 : vector<16x64xf32> to vector<1x16x64xf32>
      %146 = vector.extract_strided_slice %145 {offsets = [0, 0, 0], sizes = [1, 16, 32], strides = [1, 1, 1]} : vector<1x16x64xf32> to vector<1x16x32xf32>
      %147 = arith.truncf %146 : vector<1x16x32xf32> to vector<1x16x32xbf16>
      %c0_65 = arith.constant 0 : index
      %c0_66 = arith.constant 0 : index
      %c0_67 = arith.constant 0 : index
      %148 = vector.load %arg15[%c0_65, %c0_66, %c0_67] : memref<1x16x32xbf16, #tpu.memory_space<vmem>>, vector<1x16x32xbf16>
      tpu.vector_store %arg15[%c0_65, %c0_66, %c0_67], %147 {strides = array<i32>} : memref<1x16x32xbf16, #tpu.memory_space<vmem>>, vector<1x16x32xbf16>,
      %149 = vector.extract_strided_slice %145 {offsets = [0, 0, 32], sizes = [1, 16, 32], strides = [1, 1, 1]} : vector<1x16x64xf32> to vector<1x16x32xf32>
      %150 = arith.truncf %149 : vector<1x16x32xf32> to vector<1x16x32xbf16>
      %c0_68 = arith.constant 0 : index
      %c0_69 = arith.constant 0 : index
      %c0_70 = arith.constant 0 : index
      %151 = vector.load %arg16[%c0_68, %c0_69, %c0_70] : memref<1x16x32xbf16, #tpu.memory_space<vmem>>, vector<1x16x32xbf16>
      tpu.vector_store %arg16[%c0_68, %c0_69, %c0_70], %150 {strides = array<i32>} : memref<1x16x32xbf16, #tpu.memory_space<vmem>>, vector<1x16x32xbf16>,
    } else {
    }
    %c0 = arith.constant 0 : index
    %c0_1 = arith.constant 0 : index
    %c0_2 = arith.constant 0 : index
    %3 = vector.load %arg2[%c0, %c0_1, %c0_2] : memref<1x8x32xf32, #tpu.memory_space<vmem>>, vector<1x8x32xf32>
    %4 = arith.truncf %3 : vector<1x8x32xf32> to vector<1x8x32xbf16>
    %5 = vector.shape_cast %4 : vector<1x8x32xbf16> to vector<8x32xbf16>
    %c0_3 = arith.constant 0 : index
    %c0_4 = arith.constant 0 : index
    %6 = vector.load %arg4[%c0_3, %c0_4] : memref<32x32xbf16, #tpu.memory_space<vmem>>, vector<32x32xbf16>
    %cst = arith.constant dense<0.000000e+00> : vector<8x32xf32>
    %7 = tpu.matmul %5, %6, %cst {dimension_numbers = #tpu.dot_dimension_numbers<[1], [0], [0], [1], [0, 0, 1, 1], [], []>} : vector<8x32xbf16>, vector<32x32xbf16>, vector<8x32xf32> -> vector<8x32xf32>
    %8 = vector.shape_cast %7 : vector<8x32xf32> to vector<1x8x32xf32>
    %9 = arith.truncf %8 : vector<1x8x32xf32> to vector<1x8x32xbf16>
    %c0_5 = arith.constant 0 : index
    %c0_6 = arith.constant 0 : index
    %c0_7 = arith.constant 0 : index
    %10 = vector.load %arg15[%c0_5, %c0_6, %c0_7] : memref<1x16x32xbf16, #tpu.memory_space<vmem>>, vector<1x16x32xbf16>
    %c0_8 = arith.constant 0 : index
    %c0_9 = arith.constant 0 : index
    %c0_10 = arith.constant 0 : index
    %11 = vector.load %arg16[%c0_8, %c0_9, %c0_10] : memref<1x16x32xbf16, #tpu.memory_space<vmem>>, vector<1x16x32xbf16>
    %12 = vector.extract_strided_slice %9 {offsets = [0, 0, 0], sizes = [1, 8, 8], strides = [1, 1, 1]} : vector<1x8x32xbf16> to vector<1x8x8xbf16>
    %13 = vector.extract_strided_slice %10 {offsets = [0, 0, 0], sizes = [1, 16, 8], strides = [1, 1, 1]} : vector<1x16x32xbf16> to vector<1x16x8xbf16>
    "tpu.trace_start"() <{level = 10 : i32, message = "bqd,bkd->bqk"}> : () -> ()
    %cst_11 = arith.constant dense<0.000000e+00> : vector<1x8x16xf32>
    %14 = tpu.matmul %12, %13, %cst_11 {dimension_numbers = #tpu.dot_dimension_numbers<[2], [2], [1], [1], [0, 0, 0, 1, 1, 1], [0], [0]>} : vector<1x8x8xbf16>, vector<1x16x8xbf16>, vector<1x8x16xf32> -> vector<1x8x16xf32>
    "tpu.trace_stop"() : () -> ()
    %cst_12 = arith.constant dense<0xFF800000> : vector<1x8xf32>
    %15 = vector.multi_reduction <maximumf>, %14, %cst_12 [2] : vector<1x8x16xf32> to vector<1x8xf32>
    %16 = vector.shape_cast %15 : vector<1x8xf32> to vector<1x8x1xf32>
    %17 = vector.broadcast %16 : vector<1x8x1xf32> to vector<1x8x16xf32>
    %18 = arith.subf %14, %17 : vector<1x8x16xf32>
    %19 = math.exp %18 : vector<1x8x16xf32>
    %cst_13 = arith.constant dense<0.000000e+00> : vector<1x8xf32>
    %20 = vector.multi_reduction <add>, %19, %cst_13 [2] : vector<1x8x16xf32> to vector<1x8xf32>
    %21 = vector.shape_cast %20 : vector<1x8xf32> to vector<1x8x1xf32>
    %22 = vector.broadcast %21 : vector<1x8x1xf32> to vector<1x8x16xf32>
    %23 = arith.divf %19, %22 : vector<1x8x16xf32>
    %24 = arith.truncf %23 : vector<1x8x16xf32> to vector<1x8x16xbf16>
    %25 = vector.extract_strided_slice %11 {offsets = [0, 0, 0], sizes = [1, 16, 8], strides = [1, 1, 1]} : vector<1x16x32xbf16> to vector<1x16x8xbf16>
    "tpu.trace_start"() <{level = 10 : i32, message = "bqk,bkd->bqd"}> : () -> ()
    %cst_14 = arith.constant dense<0.000000e+00> : vector<1x8x8xf32>
    %26 = tpu.matmul %24, %25, %cst_14 {dimension_numbers = #tpu.dot_dimension_numbers<[2], [1], [1], [2], [0, 0, 0, 1, 1, 2], [0], [0]>} : vector<1x8x16xbf16>, vector<1x16x8xbf16>, vector<1x8x8xf32> -> vector<1x8x8xf32>
    "tpu.trace_stop"() : () -> ()
    %27 = vector.extract_strided_slice %9 {offsets = [0, 0, 8], sizes = [1, 8, 8], strides = [1, 1, 1]} : vector<1x8x32xbf16> to vector<1x8x8xbf16>
    %28 = vector.extract_strided_slice %10 {offsets = [0, 0, 8], sizes = [1, 16, 8], strides = [1, 1, 1]} : vector<1x16x32xbf16> to vector<1x16x8xbf16>
    "tpu.trace_start"() <{level = 10 : i32, message = "bqd,bkd->bqk"}> : () -> ()
    %cst_15 = arith.constant dense<0.000000e+00> : vector<1x8x16xf32>
    %29 = tpu.matmul %27, %28, %cst_15 {dimension_numbers = #tpu.dot_dimension_numbers<[2], [2], [1], [1], [0, 0, 0, 1, 1, 1], [0], [0]>} : vector<1x8x8xbf16>, vector<1x16x8xbf16>, vector<1x8x16xf32> -> vector<1x8x16xf32>
    "tpu.trace_stop"() : () -> ()
    %cst_16 = arith.constant dense<0xFF800000> : vector<1x8xf32>
    %30 = vector.multi_reduction <maximumf>, %29, %cst_16 [2] : vector<1x8x16xf32> to vector<1x8xf32>
    %31 = vector.shape_cast %30 : vector<1x8xf32> to vector<1x8x1xf32>
    %32 = vector.broadcast %31 : vector<1x8x1xf32> to vector<1x8x16xf32>
    %33 = arith.subf %29, %32 : vector<1x8x16xf32>
    %34 = math.exp %33 : vector<1x8x16xf32>
    %cst_17 = arith.constant dense<0.000000e+00> : vector<1x8xf32>
    %35 = vector.multi_reduction <add>, %34, %cst_17 [2] : vector<1x8x16xf32> to vector<1x8xf32>
    %36 = vector.shape_cast %35 : vector<1x8xf32> to vector<1x8x1xf32>
    %37 = vector.broadcast %36 : vector<1x8x1xf32> to vector<1x8x16xf32>
    %38 = arith.divf %34, %37 : vector<1x8x16xf32>
    %39 = arith.truncf %38 : vector<1x8x16xf32> to vector<1x8x16xbf16>
    %40 = vector.extract_strided_slice %11 {offsets = [0, 0, 8], sizes = [1, 16, 8], strides = [1, 1, 1]} : vector<1x16x32xbf16> to vector<1x16x8xbf16>
    "tpu.trace_start"() <{level = 10 : i32, message = "bqk,bkd->bqd"}> : () -> ()
    %cst_18 = arith.constant dense<0.000000e+00> : vector<1x8x8xf32>
    %41 = tpu.matmul %39, %40, %cst_18 {dimension_numbers = #tpu.dot_dimension_numbers<[2], [1], [1], [2], [0, 0, 0, 1, 1, 2], [0], [0]>} : vector<1x8x16xbf16>, vector<1x16x8xbf16>, vector<1x8x8xf32> -> vector<1x8x8xf32>
    "tpu.trace_stop"() : () -> ()
    %42 = vector.extract_strided_slice %9 {offsets = [0, 0, 16], sizes = [1, 8, 8], strides = [1, 1, 1]} : vector<1x8x32xbf16> to vector<1x8x8xbf16>
    %43 = vector.extract_strided_slice %10 {offsets = [0, 0, 16], sizes = [1, 16, 8], strides = [1, 1, 1]} : vector<1x16x32xbf16> to vector<1x16x8xbf16>
    "tpu.trace_start"() <{level = 10 : i32, message = "bqd,bkd->bqk"}> : () -> ()
    %cst_19 = arith.constant dense<0.000000e+00> : vector<1x8x16xf32>
    %44 = tpu.matmul %42, %43, %cst_19 {dimension_numbers = #tpu.dot_dimension_numbers<[2], [2], [1], [1], [0, 0, 0, 1, 1, 1], [0], [0]>} : vector<1x8x8xbf16>, vector<1x16x8xbf16>, vector<1x8x16xf32> -> vector<1x8x16xf32>
    "tpu.trace_stop"() : () -> ()
    %cst_20 = arith.constant dense<0xFF800000> : vector<1x8xf32>
    %45 = vector.multi_reduction <maximumf>, %44, %cst_20 [2] : vector<1x8x16xf32> to vector<1x8xf32>
    %46 = vector.shape_cast %45 : vector<1x8xf32> to vector<1x8x1xf32>
    %47 = vector.broadcast %46 : vector<1x8x1xf32> to vector<1x8x16xf32>
    %48 = arith.subf %44, %47 : vector<1x8x16xf32>
    %49 = math.exp %48 : vector<1x8x16xf32>
    %cst_21 = arith.constant dense<0.000000e+00> : vector<1x8xf32>
    %50 = vector.multi_reduction <add>, %49, %cst_21 [2] : vector<1x8x16xf32> to vector<1x8xf32>
    %51 = vector.shape_cast %50 : vector<1x8xf32> to vector<1x8x1xf32>
    %52 = vector.broadcast %51 : vector<1x8x1xf32> to vector<1x8x16xf32>
    %53 = arith.divf %49, %52 : vector<1x8x16xf32>
    %54 = arith.truncf %53 : vector<1x8x16xf32> to vector<1x8x16xbf16>
    %55 = vector.extract_strided_slice %11 {offsets = [0, 0, 16], sizes = [1, 16, 8], strides = [1, 1, 1]} : vector<1x16x32xbf16> to vector<1x16x8xbf16>
    "tpu.trace_start"() <{level = 10 : i32, message = "bqk,bkd->bqd"}> : () -> ()
    %cst_22 = arith.constant dense<0.000000e+00> : vector<1x8x8xf32>
    %56 = tpu.matmul %54, %55, %cst_22 {dimension_numbers = #tpu.dot_dimension_numbers<[2], [1], [1], [2], [0, 0, 0, 1, 1, 2], [0], [0]>} : vector<1x8x16xbf16>, vector<1x16x8xbf16>, vector<1x8x8xf32> -> vector<1x8x8xf32>
    "tpu.trace_stop"() : () -> ()
    %57 = vector.extract_strided_slice %9 {offsets = [0, 0, 24], sizes = [1, 8, 8], strides = [1, 1, 1]} : vector<1x8x32xbf16> to vector<1x8x8xbf16>
    %58 = vector.extract_strided_slice %10 {offsets = [0, 0, 24], sizes = [1, 16, 8], strides = [1, 1, 1]} : vector<1x16x32xbf16> to vector<1x16x8xbf16>
    "tpu.trace_start"() <{level = 10 : i32, message = "bqd,bkd->bqk"}> : () -> ()
    %cst_23 = arith.constant dense<0.000000e+00> : vector<1x8x16xf32>
    %59 = tpu.matmul %57, %58, %cst_23 {dimension_numbers = #tpu.dot_dimension_numbers<[2], [2], [1], [1], [0, 0, 0, 1, 1, 1], [0], [0]>} : vector<1x8x8xbf16>, vector<1x16x8xbf16>, vector<1x8x16xf32> -> vector<1x8x16xf32>
    "tpu.trace_stop"() : () -> ()
    %cst_24 = arith.constant dense<0xFF800000> : vector<1x8xf32>
    %60 = vector.multi_reduction <maximumf>, %59, %cst_24 [2] : vector<1x8x16xf32> to vector<1x8xf32>
    %61 = vector.shape_cast %60 : vector<1x8xf32> to vector<1x8x1xf32>
    %62 = vector.broadcast %61 : vector<1x8x1xf32> to vector<1x8x16xf32>
    %63 = arith.subf %59, %62 : vector<1x8x16xf32>
    %64 = math.exp %63 : vector<1x8x16xf32>
    %cst_25 = arith.constant dense<0.000000e+00> : vector<1x8xf32>
    %65 = vector.multi_reduction <add>, %64, %cst_25 [2] : vector<1x8x16xf32> to vector<1x8xf32>
    %66 = vector.shape_cast %65 : vector<1x8xf32> to vector<1x8x1xf32>
    %67 = vector.broadcast %66 : vector<1x8x1xf32> to vector<1x8x16xf32>
    %68 = arith.divf %64, %67 : vector<1x8x16xf32>
    %69 = arith.truncf %68 : vector<1x8x16xf32> to vector<1x8x16xbf16>
    %70 = vector.extract_strided_slice %11 {offsets = [0, 0, 24], sizes = [1, 16, 8], strides = [1, 1, 1]} : vector<1x16x32xbf16> to vector<1x16x8xbf16>
    "tpu.trace_start"() <{level = 10 : i32, message = "bqk,bkd->bqd"}> : () -> ()
    %cst_26 = arith.constant dense<0.000000e+00> : vector<1x8x8xf32>
    %71 = tpu.matmul %69, %70, %cst_26 {dimension_numbers = #tpu.dot_dimension_numbers<[2], [1], [1], [2], [0, 0, 0, 1, 1, 2], [0], [0]>} : vector<1x8x16xbf16>, vector<1x16x8xbf16>, vector<1x8x8xf32> -> vector<1x8x8xf32>
    "tpu.trace_stop"() : () -> ()
    %72 = tpu.concatenate %26, %41, %56, %71 in 2 : vector<1x8x8xf32>, vector<1x8x8xf32>, vector<1x8x8xf32>, vector<1x8x8xf32> -> vector<1x8x32xf32>
    %73 = arith.addf %72, %3 : vector<1x8x32xf32>
    %c0_27 = arith.constant 0 : index
    %c0_28 = arith.constant 0 : index
    %74 = vector.load %arg6[%c0_27, %c0_28] : memref<1x32xf32, #tpu.memory_space<vmem>>, vector<1x32xf32>
    %c0_29 = arith.constant 0 : index
    %c0_30 = arith.constant 0 : index
    %75 = vector.load %arg7[%c0_29, %c0_30] : memref<1x32xf32, #tpu.memory_space<vmem>>, vector<1x32xf32>
    %cst_31 = arith.constant dense<0.000000e+00> : vector<1x8xf32>
    %76 = vector.multi_reduction <add>, %73, %cst_31 [2] : vector<1x8x32xf32> to vector<1x8xf32>
    %77 = vector.shape_cast %76 : vector<1x8xf32> to vector<1x8x1xf32>
    %cst_32 = arith.constant 3.200000e+01 : f32
    %78 = vector.broadcast %cst_32 : f32 to vector<1x8x1xf32>
    %79 = arith.divf %77, %78 : vector<1x8x1xf32>
    %80 = vector.broadcast %79 : vector<1x8x1xf32> to vector<1x8x32xf32>
    %81 = arith.subf %73, %80 : vector<1x8x32xf32>
    %82 = arith.mulf %81, %81 : vector<1x8x32xf32>
    %cst_33 = arith.constant dense<0.000000e+00> : vector<1x8xf32>
    %83 = vector.multi_reduction <add>, %82, %cst_33 [2] : vector<1x8x32xf32> to vector<1x8xf32>
    %84 = vector.shape_cast %83 : vector<1x8xf32> to vector<1x8x1xf32>
    %cst_34 = arith.constant 3.200000e+01 : f32
    %85 = vector.broadcast %cst_34 : f32 to vector<1x8x1xf32>
    %86 = arith.divf %84, %85 : vector<1x8x1xf32>
    %cst_35 = arith.constant 9.99999974E-6 : f32
    %87 = vector.broadcast %cst_35 : f32 to vector<1x8x1xf32>
    %88 = arith.addf %86, %87 : vector<1x8x1xf32>
    %89 = math.rsqrt %88 : vector<1x8x1xf32>
    %90 = vector.broadcast %89 : vector<1x8x1xf32> to vector<1x8x32xf32>
    %91 = arith.mulf %81, %90 : vector<1x8x32xf32>
    %92 = vector.shape_cast %74 : vector<1x32xf32> to vector<1x1x32xf32>
    %93 = vector.broadcast %92 : vector<1x1x32xf32> to vector<1x8x32xf32>
    %94 = arith.mulf %91, %93 : vector<1x8x32xf32>
    %95 = vector.shape_cast %75 : vector<1x32xf32> to vector<1x1x32xf32>
    %96 = vector.broadcast %95 : vector<1x1x32xf32> to vector<1x8x32xf32>
    %97 = arith.addf %94, %96 : vector<1x8x32xf32>
    %98 = arith.truncf %97 : vector<1x8x32xf32> to vector<1x8x32xbf16>
    %99 = vector.shape_cast %98 : vector<1x8x32xbf16> to vector<8x32xbf16>
    %c0_36 = arith.constant 0 : index
    %c0_37 = arith.constant 0 : index
    %100 = vector.load %arg8[%c0_36, %c0_37] : memref<32x128xbf16, #tpu.memory_space<vmem>>, vector<32x128xbf16>
    %cst_38 = arith.constant dense<0.000000e+00> : vector<8x128xf32>
    %101 = tpu.matmul %99, %100, %cst_38 {dimension_numbers = #tpu.dot_dimension_numbers<[1], [0], [0], [1], [0, 0, 1, 1], [], []>} : vector<8x32xbf16>, vector<32x128xbf16>, vector<8x128xf32> -> vector<8x128xf32>
    %c0_39 = arith.constant 0 : index
    %c0_40 = arith.constant 0 : index
    %102 = vector.load %arg9[%c0_39, %c0_40] : memref<1x128xf32, #tpu.memory_space<vmem>>, vector<1x128xf32>
    %103 = vector.broadcast %102 : vector<1x128xf32> to vector<8x128xf32>
    %104 = arith.addf %101, %103 : vector<8x128xf32>
    %cst_41 = arith.constant 0.000000e+00 : f32
    %105 = vector.broadcast %cst_41 : f32 to vector<8x128xf32>
    %106 = arith.maximumf %104, %105 : vector<8x128xf32>
    %107 = arith.truncf %106 : vector<8x128xf32> to vector<8x128xbf16>
    %c0_42 = arith.constant 0 : index
    %c0_43 = arith.constant 0 : index
    %108 = vector.load %arg10[%c0_42, %c0_43] : memref<128x32xbf16, #tpu.memory_space<vmem>>, vector<128x32xbf16>
    %cst_44 = arith.constant dense<0.000000e+00> : vector<8x32xf32>
    %109 = tpu.matmul %107, %108, %cst_44 {dimension_numbers = #tpu.dot_dimension_numbers<[1], [0], [0], [1], [0, 0, 1, 1], [], []>} : vector<8x128xbf16>, vector<128x32xbf16>, vector<8x32xf32> -> vector<8x32xf32>
    %c0_45 = arith.constant 0 : index
    %c0_46 = arith.constant 0 : index
    %110 = vector.load %arg11[%c0_45, %c0_46] : memref<1x32xf32, #tpu.memory_space<vmem>>, vector<1x32xf32>
    %111 = vector.broadcast %110 : vector<1x32xf32> to vector<8x32xf32>
    %112 = arith.addf %109, %111 : vector<8x32xf32>
    %113 = vector.shape_cast %112 : vector<8x32xf32> to vector<1x8x32xf32>
    %114 = arith.addf %113, %97 : vector<1x8x32xf32>
    %c0_47 = arith.constant 0 : index
    %c0_48 = arith.constant 0 : index
    %115 = vector.load %arg12[%c0_47, %c0_48] : memref<1x32xf32, #tpu.memory_space<vmem>>, vector<1x32xf32>
    %c0_49 = arith.constant 0 : index
    %c0_50 = arith.constant 0 : index
    %116 = vector.load %arg13[%c0_49, %c0_50] : memref<1x32xf32, #tpu.memory_space<vmem>>, vector<1x32xf32>
    %cst_51 = arith.constant dense<0.000000e+00> : vector<1x8xf32>
    %117 = vector.multi_reduction <add>, %114, %cst_51 [2] : vector<1x8x32xf32> to vector<1x8xf32>
    %118 = vector.shape_cast %117 : vector<1x8xf32> to vector<1x8x1xf32>
    %cst_52 = arith.constant 3.200000e+01 : f32
    %119 = vector.broadcast %cst_52 : f32 to vector<1x8x1xf32>
    %120 = arith.divf %118, %119 : vector<1x8x1xf32>
    %121 = vector.broadcast %120 : vector<1x8x1xf32> to vector<1x8x32xf32>
    %122 = arith.subf %114, %121 : vector<1x8x32xf32>
    %123 = arith.mulf %122, %122 : vector<1x8x32xf32>
    %cst_53 = arith.constant dense<0.000000e+00> : vector<1x8xf32>
    %124 = vector.multi_reduction <add>, %123, %cst_53 [2] : vector<1x8x32xf32> to vector<1x8xf32>
    %125 = vector.shape_cast %124 : vector<1x8xf32> to vector<1x8x1xf32>
    %cst_54 = arith.constant 3.200000e+01 : f32
    %126 = vector.broadcast %cst_54 : f32 to vector<1x8x1xf32>
    %127 = arith.divf %125, %126 : vector<1x8x1xf32>
    %cst_55 = arith.constant 9.99999974E-6 : f32
    %128 = vector.broadcast %cst_55 : f32 to vector<1x8x1xf32>
    %129 = arith.addf %127, %128 : vector<1x8x1xf32>
    %130 = math.rsqrt %129 : vector<1x8x1xf32>
    %131 = vector.broadcast %130 : vector<1x8x1xf32> to vector<1x8x32xf32>
    %132 = arith.mulf %122, %131 : vector<1x8x32xf32>
    %133 = vector.shape_cast %115 : vector<1x32xf32> to vector<1x1x32xf32>
    %134 = vector.broadcast %133 : vector<1x1x32xf32> to vector<1x8x32xf32>
    %135 = arith.mulf %132, %134 : vector<1x8x32xf32>
    %136 = vector.shape_cast %116 : vector<1x32xf32> to vector<1x1x32xf32>
    %137 = vector.broadcast %136 : vector<1x1x32xf32> to vector<1x8x32xf32>
    %138 = arith.addf %135, %137 : vector<1x8x32xf32>
    %c0_56 = arith.constant 0 : index
    %c0_57 = arith.constant 0 : index
    %c0_58 = arith.constant 0 : index
    %139 = vector.load %arg14[%c0_56, %c0_57, %c0_58] : memref<1x8x32xf32, #tpu.memory_space<vmem>>, vector<1x8x32xf32>
    tpu.vector_store %arg14[%c0_56, %c0_57, %c0_58], %138 {strides = array<i32>} : memref<1x8x32xf32, #tpu.memory_space<vmem>>, vector<1x8x32xf32>,
    return
  }
  func.func @transform_0(%arg0: i32, %arg1: i32) -> (i32, i32, i32) {
    %c0_i32 = arith.constant 0 : i32
    %c0_i32_0 = arith.constant 0 : i32
    return %arg0, %arg1, %c0_i32 : i32, i32, i32
  }
  func.func @transform_1(%arg0: i32, %arg1: i32) -> (i32, i32, i32) {
    %c0_i32 = arith.constant 0 : i32
    %c0_i32_0 = arith.constant 0 : i32
    %c0_i32_1 = arith.constant 0 : i32
    return %arg0, %c0_i32, %c0_i32_0 : i32, i32, i32
  }
  func.func @transform_2(%arg0: i32, %arg1: i32) -> (i32, i32) {
    %c0_i32 = arith.constant 0 : i32
    %c0_i32_0 = arith.constant 0 : i32
    %c0_i32_1 = arith.constant 0 : i32
    return %c0_i32, %c0_i32_0 : i32, i32
  }
  func.func @transform_3(%arg0: i32, %arg1: i32) -> (i32, i32) {
    %c0_i32 = arith.constant 0 : i32
    %c0_i32_0 = arith.constant 0 : i32
    %c0_i32_1 = arith.constant 0 : i32
    return %c0_i32, %c0_i32_0 : i32, i32
  }
  func.func @transform_4(%arg0: i32, %arg1: i32) -> (i32, i32) {
    %c0_i32 = arith.constant 0 : i32
    %c0_i32_0 = arith.constant 0 : i32
    %c0_i32_1 = arith.constant 0 : i32
    return %c0_i32, %c0_i32_0 : i32, i32
  }
  func.func @transform_5(%arg0: i32, %arg1: i32) -> (i32, i32) {
    %c0_i32 = arith.constant 0 : i32
    %c0_i32_0 = arith.constant 0 : i32
    %c0_i32_1 = arith.constant 0 : i32
    return %c0_i32, %c0_i32_0 : i32, i32
  }
  func.func @transform_6(%arg0: i32, %arg1: i32) -> (i32, i32) {
    %c0_i32 = arith.constant 0 : i32
    %c0_i32_0 = arith.constant 0 : i32
    %c0_i32_1 = arith.constant 0 : i32
    return %c0_i32, %c0_i32_0 : i32, i32
  }
  func.func @transform_7(%arg0: i32, %arg1: i32) -> (i32, i32) {
    %c0_i32 = arith.constant 0 : i32
    %c0_i32_0 = arith.constant 0 : i32
    %c0_i32_1 = arith.constant 0 : i32
    return %c0_i32, %c0_i32_0 : i32, i32
  }
  func.func @transform_8(%arg0: i32, %arg1: i32) -> (i32, i32) {
    %c0_i32 = arith.constant 0 : i32
    %c0_i32_0 = arith.constant 0 : i32
    %c0_i32_1 = arith.constant 0 : i32
    return %c0_i32, %c0_i32_0 : i32, i32
  }
  func.func @transform_9(%arg0: i32, %arg1: i32) -> (i32, i32) {
    %c0_i32 = arith.constant 0 : i32
    %c0_i32_0 = arith.constant 0 : i32
    %c0_i32_1 = arith.constant 0 : i32
    return %c0_i32, %c0_i32_0 : i32, i32
  }
  func.func @transform_10(%arg0: i32, %arg1: i32) -> (i32, i32) {
    %c0_i32 = arith.constant 0 : i32
    %c0_i32_0 = arith.constant 0 : i32
    %c0_i32_1 = arith.constant 0 : i32
    return %c0_i32, %c0_i32_0 : i32, i32
  }
  func.func @transform_11(%arg0: i32, %arg1: i32) -> (i32, i32) {
    %c0_i32 = arith.constant 0 : i32
    %c0_i32_0 = arith.constant 0 : i32
    %c0_i32_1 = arith.constant 0 : i32
    return %c0_i32, %c0_i32_0 : i32, i32
  }
  func.func @transform_12(%arg0: i32, %arg1: i32) -> (i32, i32, i32) {
    %c0_i32 = arith.constant 0 : i32
    %c0_i32_0 = arith.constant 0 : i32
    return %arg0, %arg1, %c0_i32 : i32, i32, i32
  }
}

</mosaic_0001>

<bundles_post_ra>
// kernel: tpu_custom_call.1
= control target key start
LH: loop header
LB: loop body
LE: loop exit
PB: predicated region body
PF: predicated region fallthrough
CT: control target
= control target key end

     0   :  { %17 = vsyncpa [#allocation5], 0  ;;  %s2185_s0 = inlined_call_operand.vmem [shape: f32[2,8,32], index: 0, kind: input, shape index: {}]   ;;  %s2186_s1 = inlined_call_operand.vmem [shape: f32[2,16,32], index: 1, kind: input, shape index: {}]   ;;  %s2187_s2 = inlined_call_operand.vmem [shape: bf16[32,32], index: 2, kind: input, shape index: {}]   ;;  %s2188_s3 = inlined_call_operand.vmem [shape: bf16[32,64], index: 3, kind: input, shape index: {}]   ;;  %s2189_s4 = inlined_call_operand.vmem [shape: f32[1,32], index: 4, kind: input, shape index: {}]   ;;  %s2190_s5 = inlined_call_operand.vmem [shape: f32[1,32], index: 5, kind: input, shape index: {}]   ;;  %s2191_s6 = inlined_call_operand.hbm [shape: bf16[32,128], index: 6, kind: input, shape index: {}]   ;;  %s2192_s7 = inlined_call_operand.vmem [shape: f32[1,128], index: 7, kind: input, shape index: {}]   ;;  %s2193_s8 = inlined_call_operand.vmem [shape: bf16[128,32], index: 8, kind: input, shape index: {}]   ;;  %s2194_s9 = inlined_call_operand.vmem [shape: f32[1,32], index: 9, kind: input, shape index: {}]   ;;  %s2195_s10 = inlined_call_operand.vmem [shape: f32[1,32], index: 10, kind: input, shape index: {}]   ;;  %s2196_s11 = inlined_call_operand.vmem [shape: f32[1,32], index: 11, kind: input, shape index: {}]   ;;  %s2197_s12 = inlined_call_operand.hbm [shape: f32[2,8,32], index: 12, kind: output, shape index: {}]  }
   0x1   :  { %18 = vsyncpa [#allocation6], 0 }
   0x2   :  { %20 = vsyncpa [#allocation6 + $0x1], 0  ;;  %s1882_s21 = smov 0   ;;  %s1884_s22 = smov 0  }
   0x3   :  { %s1886_s23 = smov 0   ;;  %s1888_s24 = smov 0  }
   0x4   :  { %s1890_s25 = smov 0   ;;  %s1892_s26 = smov 0  }
   0x5 LB: > { %2205 = sst [smem:[#allocation10_spill]] %s1790_s23  ;;  %s1408_s27 = sadd.s32 4294967295, %s1802_s26   ;;  %s1802_s26 = sphi %s1892_s26, %s26_s26   ;;  %s1798_s25 = sphi %s1890_s25, %s2221_s25   ;;  %s1794_s24 = sphi %s1888_s24, %s2220_s24   ;;  %s1790_s23 = sphi %s1886_s23, %s2219_s23   ;;  %s1786_s22 = sphi %s1884_s22, %s2223_s22   ;;  %s1782_s21 = sphi %s1882_s21, %s2222_s21  }
   0x6   : > { %2206 = sst [smem:[#allocation11_spill]] %s1798_s25  ;;  %s1409_s28 = sadd.s32 4294967294, %s1802_s26  }
   0x7   : > { %s38_s29 = sadd.s32 1, %s1798_s25  ;;  %s311_s30 = sadd.s32 1, %s1790_s23 }
   0x8   : > { %p40_p0 = scmp.ge.s32.totalorder %s38_s29, 2  ;;  %p321_p1 = scmp.ne.s32.totalorder %s1790_s23, %s1786_s22 }
   0x9   : > { %p322_p2 = scmp.eq.s32.totalorder %s1408_s27, 1  ;;  %p327_p3 = scmp.ne.s32.totalorder %s1786_s22, %s1782_s21 }
   0xa   : > { %s2225_s29 = smov (%p40_p0, %s38_s29), 0  ;;  %p328_p5 = scmp.eq.s32.totalorder %s1409_s28, 1 }
   0xb   : > { %2207 = sst [smem:[#allocation12_spill]] %s2225_s29  ;;  %p1922_p4 = por %p322_p2, %p321_p1 }
   0xc   : > { %s306_s14 = ssub.s32 %s1798_s25, %s2225_s29  ;;  %p1410_p6 = scmp.ge.s32.totalorder %s1802_s26, 1 }
   0xd   : > { %s2208_s13 = scalar_select %p1922_p4, 1, 0 }
   0xe   : > { %p309_p7 = scmp.eq.s32.totalorder %s306_s14, 0  ;;  %p1929_p8 = por %p328_p5, %p327_p3 }
   0xf   : > { %p335_p9 = scmp.lt.s32.totalorder %s1802_s26, 3  ;;  %p1941_p11 = scmp.eq.s32.totalorder %s1408_s27, 0 }
  0x10   : > { %s2209_s15 = scalar_select %p1929_p8, 1, 0 }
  0x11   : > { %s1935_s16 = scalar_select %p309_p7, %s1790_s23, %s311_s30  }
  0x12   : > { %p1937_p10 = pnand %p1410_p6, %p335_p9  ;;  %s1804_s19 = smov [#allocation4]  }
  0x13   : > { %2210 = sst [smem:[#allocation13_spill]] %s1935_s16  ;;  %s359_s20 = sshll.u32 %s1804_s19, 4  ;;  %s360_s20 = int_to_ptr.vmem [resolvable:$true] %s359_s20 }
  0x14   : > { %s2211_s17 = scalar_select %p1937_p10, 1, 0 }
  0x15   : > { %s2212_s18 = scalar_select %p1941_p11, 1, 0 }
  0x16   : > { %p1587_p12 = pneg %p1937_p10  ;;  %s1692_s29 = scalar_lea.hbm %s2191_s6, 256 }
  0x17   : > { %p1693_p0 = scmp.ne.s32.totalorder %s2191_s6, %s1692_s29  ;;  %p1699_p5 = scmp.lt.u32.totalorder %s1692_s29, %s2191_s6 }
  0x18   : > { %p1949_p13 = pnand %p1941_p11, %p1587_p12 }
  0x1a   : > { %p1694_p1 = pneg %p1949_p13 }
  0x1c   : > { %p1695_p2 = pnand %p1694_p1, %p1693_p0 }
  0x1e   : > { %p1696_p3 = pneg %p1695_p2 }
  0x20   : > { %p1701_p6 = pnand %p1699_p5, %p1696_p3 }
  0x22   : > { %1704 = shalt.err (!%p1701_p6)
}
  0x23   : > { %s1705_s23 = scalar_lea.vmem %s360_s20, 256  ;;  %p1713_p8 = scmp.lt.s32.totalorder %s360_s20, %s360_s20 }
  0x24   : > { %p1706_p7 = scmp.ne.s32.totalorder %s360_s20, %s1705_s23  ;;  %p1714_p4 = scmp.lt.s32.totalorder %s1705_s23, %s1705_s23 }
  0x26   : > { %p1708_p9 = pnand %p1706_p7, %p1694_p1  ;;  %p1715_p11 = por %p1714_p4, %p1713_p8 }
  0x28   : > { %p1709_p12 = pneg %p1708_p9 }
  0x2a   : > { %p1716_p10 = pnand %p1715_p11, %p1709_p12 }
  0x2c   : > { %1719 = shalt.err (!%p1716_p10)
}
  0x2d   : > { %s1805_s25 = smov 64   ;;  %s1806_s30 = smov 4  }
  0x2e   : > { %1590 = dma.hbm_to_vmem [thread:$0]  (!%p1949_p13), %s2191_s6, 256, %s360_s20, [#allocation5], %s1805_s25, %s1805_s25, %s1806_s30  }
  0x2f   : > { %p2214_p0 = scmp.ne.s32.totalorder %s2211_s17, 0 }
  0x30   : > { %p2215_p2 = scmp.ne.s32.totalorder (!%p2214_p0), %s2212_s18, 0 }
  0x31   : > { %408 = sbr.rel (%p2214_p0) target bundleno = 2364 (0x93c), region = 68 }
  0x38   : > { %1773 = dma.done.wait (%p2215_p2), [#allocation5], 256  }
  0x39   : > { %1775 = vsyncadd (%p2215_p2), [#allocation5], 4294967040  ;;  %p457_p4 = scmp.lt.s32.totalorder %s1794_s24, 1  ;;  %v1807_v0 = vmov 0.0   ;;  %vm1808_vm0 = vmmov 0   ;;  %v1658_v1 = vld [vmem:[%s2188_s3] sm:$0xff]  }
  0x3a   : > { %1489 = vmatprep.subr.bf16.mxu0 %v1807_v0  ;;  %1493 = vmatprep.mubr.msk.bf16.mxu0 %vm1808_vm0, %v1807_v0  ;;  %v1659_v2 = vld [vmem:[%s2188_s3 + $0x8] sm:$0xff]   ;;  %vm493_vm1 = vcmask 261120   ;;  %v1660_v5 = vld [vmem:[%s2187_s2] sm:$0xff]   ;;  %vm610_vm2 = vcmask 64512   ;;  %s1811_s19 = smov 104   ;;  %vm657_vm3 = vcmask 130048  }
  0x3b   : > { %s458_s23 = scalar_select %p457_p4, %s1794_s24, 1  ;;  %1511 = vmatprep.subr.bf16.mxu1 %v1807_v0  ;;  %1513 = vmatprep.mubr.msk.bf16.mxu1 %vm1808_vm0, %v1807_v0  ;;  %v1661_v7 = vld [vmem:[%s2187_s2 + $0x8] sm:$0xff]   ;;  %vm1054_vm4 = vcmask 195584  }
  0x3c   : > { %1490 = vmatpush3.bf16.msra.mxu0 %v1658_v1  ;;  %s1812_s25 = smov 96   ;;  %s1814_s14 = smov 16  }
  0x3d   : > { %s1454_s29 = sshll.u32 %s458_s23, 4  ;;  %s1416_s30 = sshll.u32 %s458_s23, 3  ;;  %1491 = vmatprep.subr.bf16.mxu0 %v1807_v0 }
  0x3e   : > { %s468_s18 = scalar_lea.vmem %s2186_s1, %s1454_s29  ;;  %s463_s17 = scalar_lea.vmem %s2185_s0, %s1416_s30 }
  0x3f   : > { %v474_v3 = vld [vmem:[%s468_s18] sm:$0xff]  ;;  %v475_v4 = vld [vmem:[%s468_s18 + $0x8] sm:$0xff]  ;;  %s1809_s23 = smov 112   ;;  %s1810_s18 = smov 120  }
  0x40   : > { %v476_v6 = vpack.c.bf16 %v475_v4, %v474_v3  ;;  %1492 = vmatpush3.bf16.msra.mxu0 %v1659_v2  ;;  %v2003_v8 = vld [vmem:[%s463_s17] sm:$0xff]  ;;  %s1813_s30 = smov 8   ;;  %s1815_s27 = smov 24  }
  0x41   : > { %1497 = vmatprep.subr.bf16.mxu0 %v1807_v0  ;;  %v546_v9 = vpack.c.bf16 %v2003_v8, %v2003_v8  ;;  %s454_s29 = sand.u32 1, %s1786_s22   ;;  %p2216_p10 = scmp.ne.s32.totalorder %s2208_s13, 0 }
  0x42   : > { %s1415_s16 = sshll.u32 %s454_s29, 3  ;;  %s1299_s17 = scalar_lea.sflag [#allocation6], %s454_s29 }
  0x43   : > { %1494 = vmatmul.mubr.msk.bf16.vlgmr.msra.gmra.mrb[0].mxu0 %vm493_vm1, %v476_v6 }
  0x44   : > { %1498 = vmatpush3.bf16.msra.mxu0 %v1660_v5  ;;  %1501 = vmatprep.mubr.msk.bf16.mxu0 %vm1808_vm0, %v1807_v0 }
  0x45   : > { %1499 = vmatprep.subr.bf16.mxu0 %v1807_v0 }
  0x48   : > { %1500 = vmatpush3.bf16.msra.mxu0 %v1661_v7 }
  0x49   : > { %1505 = vmatprep.subr.bf16.mxu0 %v1807_v0 }
  0x4b   : > { %1502 = vmatmul.mubr.msk.bf16.vlgmr.msra.gmra.mrb[4].mxu0 %vm493_vm1, %v546_v9 }
  0x4c   : > { %1507 = vmatprep.mubr.msk.bf16.mxu0 %vm1808_vm0, %v1807_v0 }
 0x116   : > { %v531_v10 = vpop.f32.mrb[0].mxu0 }
 0x117   : > { %v1495_v11 = vpop.f32.mrb[1].mxu0 }
 0x118   : > { %v534_v12 = vpop.f32.mrb[2].mxu0 }
 0x119   : > { %v2015_v13 = vpack.c.bf16 %v534_v12, %v531_v10  ;;  %v1496_v14 = vpop.f32.mrb[3].mxu0 }
 0x11b   : > { %539 = vst.msk [vmem:[#allocation2] sm:$0xff] %vm493_vm1, %v2015_v13 }
 0x11e   : > { %v601_v15 = vpop.f32.mrb[4].mxu0 }
 0x11f   : > { %v1503_v16 = vpop.f32.mrb[5].mxu0  ;;  %v607_v20 = vpack.c.bf16 %v601_v15, %v601_v15 }
 0x120   : > { %v604_v17 = vpop.f32.mrb[6].mxu0 }
 0x121   : > { %v1504_v18 = vpop.f32.mrb[7].mxu0 }
 0x122   : > { %v608_v19 = vld [vmem:[#allocation2] sm:$0xff] }
 0x123   : > { %826 = vrot.lane.b32.xlu1 %v608_v19, %s1809_s23  ;;  %717 = vrot.lane.b32.xlu0 %v608_v19, %s1810_s18  ;;  %v615_v21 = vsel %vm610_vm2, %v608_v19, 0 }
 0x124   : > { %1506 = vmatpush3.bf16.xpose.msra.mxu0 %v615_v21 }
 0x125   : > { %1517 = vmatprep.subr.bf16.mxu0 %v1807_v0 }
 0x127   : > { %824 = vrot.lane.b32.xlu1 %v607_v20, %s1809_s23  ;;  %714 = vrot.lane.b32.xlu0 %v607_v20, %s1810_s18 }
 0x12b   : > { %932 = vrot.lane.b32.xlu1 %v607_v20, %s1811_s19  ;;  %934 = vrot.lane.b32.xlu0 %v608_v19, %s1811_s19 }
 0x12c   : > { %1508 = vmatmul.mubr.msk.bf16.vlgmr.msra.gmra.mrb[8].mxu0 %vm610_vm2, %v607_v20 }
 0x12d   : > { %1519 = vmatprep.mubr.msk.bf16.mxu0 %vm1808_vm0, %v1807_v0 }
 0x195   : > { %v718_v22 = vpop.permute.xlu0 %717  ;;  %v827_v24 = vpop.permute.xlu1 %826 }
 0x196   : > { %v723_v23 = vsel %vm610_vm2, %v718_v22, 0  ;;  %v832_v26 = vsel %vm610_vm2, %v827_v24, 0 }
 0x197   : > { %1518 = vmatpush3.bf16.xpose.msra.mxu0 %v723_v23 }
 0x198   : > { %1529 = vmatprep.subr.bf16.mxu0 %v1807_v0 }
 0x199   : > { %v715_v25 = vpop.permute.xlu0 %714  ;;  %v825_v28 = vpop.permute.xlu1 %824 }
 0x19d   : > { %v935_v27 = vpop.permute.xlu0 %934  ;;  %v933_v30 = vpop.permute.xlu1 %932 }
 0x19e   : > { %1520 = vmatmul.mubr.msk.bf16.vlgmr.msra.gmra.mrb[12].mxu0 %vm610_vm2, %v715_v25  ;;  %v940_v29 = vsel %vm610_vm2, %v935_v27, 0 }
 0x19f   : > { %1530 = vmatpush3.bf16.xpose.msra.mxu0 %v832_v26  ;;  %1531 = vmatprep.mubr.msk.bf16.mxu0 %vm1808_vm0, %v1807_v0 }
 0x1a0   : > { %1541 = vmatprep.subr.bf16.mxu0 %v1807_v0 }
 0x1a6   : > { %1532 = vmatmul.mubr.msk.bf16.vlgmr.msra.gmra.mrb[16].mxu0 %vm610_vm2, %v825_v28 }
 0x1a7   : > { %1542 = vmatpush3.bf16.xpose.msra.mxu0 %v940_v29  ;;  %1543 = vmatprep.mubr.msk.bf16.mxu0 %vm1808_vm0, %v1807_v0 }
 0x1a8   : > { %1553 = vmatprep.subr.bf16.mxu0 %v1807_v0 }
 0x1ae   : > { %1544 = vmatmul.mubr.msk.bf16.vlgmr.msra.gmra.mrb[20].mxu0 %vm610_vm2, %v933_v30 }
 0x1af   : > { %1557 = vmatprep.mubr.msk.bf16.mxu0 %vm1808_vm0, %v1807_v0 }
 0x1ff   : > { %v651_v31 = vpop.f32.mrb[8].mxu0 }
 0x200   : > { %v1509_v32 = vpop.f32.mrb[9].mxu0  ;;  %v658_v33 = vsel %vm657_vm3, %v651_v31, -inf }
 0x201   : > { %659 = vmax.xlane.f32.xlu0 %v658_v33  ;;  %v654_v34 = vpop.f32.mrb[10].mxu0 }
 0x202   : > { %v1510_v35 = vpop.f32.mrb[11].mxu0 }
 0x271   : > { %v759_v36 = vpop.f32.mrb[12].mxu0 }
 0x272   : > { %v1521_v37 = vpop.f32.mrb[13].mxu0  ;;  %v765_v38 = vsel %vm657_vm3, %v759_v36, -inf }
 0x273   : > { %766 = vmax.xlane.f32.xlu1 %v765_v38  ;;  %v762_v39 = vpop.f32.mrb[14].mxu0 }
 0x274   : > { %v1522_v40 = vpop.f32.mrb[15].mxu0 }
 0x279   : > { %v868_v41 = vpop.f32.mrb[16].mxu0 }
 0x27a   : > { %v1533_v42 = vpop.f32.mrb[17].mxu0  ;;  %v874_v43 = vsel %vm657_vm3, %v868_v41, -inf }
 0x27b   : > { %875 = vmax.xlane.f32.xlu0 %v874_v43  ;;  %v871_v44 = vpop.f32.mrb[18].mxu0 }
 0x27c   : > { %v1534_v45 = vpop.f32.mrb[19].mxu0 }
 0x281   : > { %v976_v46 = vpop.f32.mrb[20].mxu0 }
 0x282   : > { %v1545_v47 = vpop.f32.mrb[21].mxu0  ;;  %v982_v48 = vsel %vm657_vm3, %v976_v46, -inf }
 0x283   : > { %983 = vmax.xlane.f32.xlu0 %v982_v48  ;;  %v979_v49 = vpop.f32.mrb[22].mxu0 }
 0x284   : > { %541 = vrot.lane.b32.xlu1 %v2015_v13, %s1812_s25  ;;  %v1546_v50 = vpop.f32.mrb[23].mxu0 }
 0x28e   : > { %v660_v51 = vpop.xlane.xlu0 %659 }
 0x28f   : > { %v661_v52 = vsub.f32 %v651_v31, %v660_v51 }
 0x291   : > { %v662_v53 = vmul.f32 1.442695, %v661_v52 }
 0x293   : > { %1672 = vpow2.f32 %v662_v53 }
 0x29d   : > { %v1673_v54 = vpop.eup %1672 }
 0x29e   : > { %v664_v55 = vsel %vm657_vm3, %v1673_v54, 0.0 }
 0x29f   : > { %665 = vadd.xlane.f32.xlu0 %v664_v55 }
 0x300   : > { %v767_v56 = vpop.xlane.xlu1 %766 }
 0x301   : > { %v768_v57 = vsub.f32 %v759_v36, %v767_v56 }
 0x303   : > { %v769_v58 = vmul.f32 1.442695, %v768_v57 }
 0x304   : > { %v542_v59 = vpop.permute.xlu1 %541 }
 0x305   : > { %1674 = vpow2.f32 %v769_v58  ;;  %544 = vst.msk [vmem:[#allocation3] sm:$0xff] %vm493_vm1, %v542_v59  ;;  %v1662_v59 = vld [vmem:[#allocation4] sm:$0xff]  }
 0x306   : > { %1554 = vmatpush3.bf16.msra.mxu0 %v1662_v59 }
 0x307   : > { %1555 = vmatprep.subr.bf16.mxu0 %v1807_v0 }
 0x308   : > { %v876_v60 = vpop.xlane.xlu0 %875 }
 0x309   : > { %v877_v61 = vsub.f32 %v868_v41, %v876_v60  ;;  %v1663_v60 = vld [vmem:[#allocation4 + $0x8] sm:$0xff]  }
 0x30a   : > { %1556 = vmatpush3.bf16.msra.mxu0 %v1663_v60 }
 0x30b   : > { %v878_v62 = vmul.f32 1.442695, %v877_v61  ;;  %v1665_v61 = vld [vmem:[%s2193_s8 + $0x8] sm:$0xff]  }
 0x30c   : > { %v609_v63 = vld [vmem:[#allocation3] sm:$0xff] }
 0x30d   : > { %1676 = vpow2.f32 %v878_v62  ;;  %778 = vrot.lane.b32.xlu1 %v609_v63, %s1810_s18  ;;  %1512 = vmatpush3.bf16.msra.mxu1 %v609_v63  ;;  %v1666_v62 = vld [vmem:[%s2193_s8 + $0x10] sm:$0xff]   ;;  %s1451_s18 = sshll.u32 %s1794_s24, 7  ;;  %s1816_s24 = smov [#allocation7]  }
 0x30e   : > { %1523 = vmatprep.subr.bf16.mxu1 %v1807_v0 }
 0x30f   : > { %v1675_v1 = vpop.eup %1674 }
 0x310   : > { %v984_v2 = vpop.xlane.xlu0 %983  ;;  %v771_v3 = vsel %vm657_vm3, %v1675_v1, 0.0 }
 0x311   : > { %v985_v4 = vsub.f32 %v976_v46, %v984_v2  ;;  %994 = vrot.lane.b32.xlu1 %v609_v63, %s1811_s19  ;;  %772 = vadd.xlane.f32.xlu0 %v771_v3  ;;  %v1669_v2 = vld [vmem:[%s2193_s8 + $0x28] sm:$0xff]   ;;  %s456_s19 = scalar_lea.vmem [#allocation7], %s1415_s16  ;;  %s1724_s16 = sshll.u32 %s1816_s24, 4  ;;  %s1725_s16 = int_to_ptr.vmem [resolvable:$false] %s1724_s16 }
 0x312   : > { %s1313_s25 = sshll.u32 %s456_s19, 4  ;;  %s1726_s28 = scalar_lea.vmem %s1725_s16, 256  ;;  %s2139_s25 = int_to_ptr.vmem [resolvable:$true] %s1313_s25 }
 0x313   : > { %v986_v5 = vmul.f32 1.442695, %v985_v4  ;;  %s1720_s20 = scalar_lea.vmem %s2139_s25, 128  ;;  %p1727_p1 = scmp.lt.s32.totalorder %s2139_s25, %s1725_s16 }
 0x314   : > { %p1721_p8 = scmp.ne.s32.totalorder %s2139_s25, %s1720_s20  ;;  %p1728_p3 = scmp.lt.s32.totalorder %s1726_s28, %s1720_s20 }
 0x315   : > { %1678 = vpow2.f32 %v986_v5 }
 0x316   : > { %p1722_p11 = pnand %p1721_p8, %p2216_p10  ;;  %p1729_p5 = por %p1728_p3, %p1727_p1 }
 0x317   : > { %v1677_v6 = vpop.eup %1676 }
 0x318   : > { %v880_v7 = vsel %vm657_vm3, %v1677_v6, 0.0  ;;  %p1723_p13 = pneg %p1722_p11 }
 0x319   : > { %881 = vadd.xlane.f32.xlu0 %v880_v7  ;;  %v1433_v7 = vld [vmem:[%s2189_s4] ss:$0 sm:$0xff] }
 0x31a   : > { %p1730_p6 = pnand %p1729_p5, %p1723_p13 }
 0x31f   : > { %v1679_v9 = vpop.eup %1678 }
 0x320   : > { %v988_v10 = vsel %vm657_vm3, %v1679_v9, 0.0 }
 0x321   : > { %989 = vadd.xlane.f32.xlu0 %v988_v10  ;;  %v1434_v10 = vld [vmem:[%s2190_s5] ss:$0 sm:$0xff] }
 0x32c   : > { %v666_v11 = vpop.xlane.xlu0 %665 }
 0x32d   : > { %1680 = vrcp.f32 %v666_v11 }
 0x337   : > { %v1681_v12 = vpop.eup %1680  ;;  %886 = vrot.lane.b32.xlu0 %v609_v63, %s1809_s23  ;;  %v1667_v63 = vld [vmem:[%s2193_s8 + $0x18] sm:$0xff]  }
 0x338   : > { %v668_v13 = vmul.f32 %v1681_v12, %v1673_v54 }
 0x33a   : > { %v669_v14 = vpack.c.bf16 %v668_v13, %v668_v13 }
 0x33c   : > { %1514 = vmatmul.mubr.msk.bf16.vlgmr.msra.gmra.mrb[0].mxu1 %vm657_vm3, %v669_v14  ;;  %v1670_v14 = vld [vmem:[%s2193_s8 + $0x30] sm:$0xff]  }
 0x33d   : > { %1525 = vmatprep.mubr.msk.bf16.mxu1 %vm1808_vm0, %v1807_v0 }
 0x37f   : > { %v779_v15 = vpop.permute.xlu1 %778 }
 0x380   : > { %1524 = vmatpush3.bf16.msra.mxu1 %v779_v15  ;;  %v1671_v15 = vld [vmem:[%s2193_s8 + $0x38] sm:$0xff]  }
 0x381   : > { %1535 = vmatprep.subr.bf16.mxu1 %v1807_v0 }
 0x383   : > { %v995_v26 = vpop.permute.xlu1 %994 }
 0x39e   : > { %v773_v16 = vpop.xlane.xlu0 %772 }
 0x39f   : > { %1682 = vrcp.f32 %v773_v16  ;;  %v1435_v16 = vld [vmem:[%s2192_s7] ss:$0 sm:$0xff] }
 0x3a6   : > { %v882_v17 = vpop.xlane.xlu0 %881 }
 0x3a7   : > { %1684 = vrcp.f32 %v882_v17 }
 0x3a9   : > { %v1683_v18 = vpop.eup %1682 }
 0x3aa   : > { %v775_v19 = vmul.f32 %v1683_v18, %v1675_v1  ;;  %v1668_v1 = vld [vmem:[%s2193_s8 + $0x20] sm:$0xff]  }
 0x3ac   : > { %v776_v20 = vpack.c.bf16 %v775_v19, %v775_v19 }
 0x3ae   : > { %1526 = vmatmul.mubr.msk.bf16.vlgmr.msra.gmra.mrb[4].mxu1 %vm657_vm3, %v776_v20  ;;  %v990_v21 = vpop.xlane.xlu0 %989 }
 0x3af   : > { %1686 = vrcp.f32 %v990_v21  ;;  %1537 = vmatprep.mubr.msk.bf16.mxu1 %vm1808_vm0, %v1807_v0 }
 0x3b1   : > { %v1685_v22 = vpop.eup %1684 }
 0x3b2   : > { %v884_v23 = vmul.f32 %v1685_v22, %v1677_v6  ;;  %v887_v24 = vpop.permute.xlu0 %886 }
 0x3b3   : > { %1536 = vmatpush3.bf16.msra.mxu1 %v887_v24 }
 0x3b4   : > { %v885_v25 = vpack.c.bf16 %v884_v23, %v884_v23  ;;  %1547 = vmatprep.subr.bf16.mxu1 %v1807_v0 }
 0x3b6   : > { %1538 = vmatmul.mubr.msk.bf16.vlgmr.msra.gmra.mrb[8].mxu1 %vm657_vm3, %v885_v25 }
 0x3b7   : > { %1548 = vmatpush3.bf16.msra.mxu1 %v995_v26  ;;  %1549 = vmatprep.mubr.msk.bf16.mxu1 %vm1808_vm0, %v1807_v0 }
 0x3b8   : > { %1561 = vmatprep.subr.bf16.mxu1 %v1807_v0 }
 0x3b9   : > { %v1687_v27 = vpop.eup %1686 }
 0x3ba   : > { %v992_v28 = vmul.f32 %v1687_v27, %v1679_v9 }
 0x3bc   : > { %v993_v29 = vpack.c.bf16 %v992_v28, %v992_v28 }
 0x3be   : > { %1550 = vmatmul.mubr.msk.bf16.vlgmr.msra.gmra.mrb[12].mxu1 %vm657_vm3, %v993_v29 }
 0x3bf   : > { %1577 = vmatprep.mubr.msk.bf16.mxu1 %vm1808_vm0, %v1807_v0 }
 0x40f   : > { %v707_v30 = vpop.f32.mrb[0].mxu1 }
 0x410   : > { %v1515_v31 = vpop.f32.mrb[1].mxu1 }
 0x411   : > { %v710_v32 = vpop.f32.mrb[2].mxu1 }
 0x412   : > { %v1516_v33 = vpop.f32.mrb[3].mxu1 }
 0x481   : > { %v818_v34 = vpop.f32.mrb[4].mxu1 }
 0x482   : > { %1041 = vrot.lane.b32.xlu1 %v818_v34, %s1813_s30  ;;  %v1527_v35 = vpop.f32.mrb[5].mxu1 }
 0x483   : > { %v821_v36 = vpop.f32.mrb[6].mxu1 }
 0x484   : > { %v1528_v37 = vpop.f32.mrb[7].mxu1 }
 0x489   : > { %v926_v38 = vpop.f32.mrb[8].mxu1 }
 0x48a   : > { %1045 = vrot.lane.b32.xlu1 %v926_v38, %s1814_s14  ;;  %v1539_v39 = vpop.f32.mrb[9].mxu1 }
 0x48b   : > { %v929_v40 = vpop.f32.mrb[10].mxu1 }
 0x48c   : > { %v1540_v41 = vpop.f32.mrb[11].mxu1  ;;  %v1448_v40 = vld [vmem:[%s2195_s10] ss:$0 sm:$0xff] }
 0x491   : > { %v1034_v42 = vpop.f32.mrb[12].mxu1 }
 0x492   : > { %1049 = vrot.lane.b32.xlu1 %v1034_v42, %s1815_s27  ;;  %v1551_v43 = vpop.f32.mrb[13].mxu1  ;;  %v1449_v42 = vld [vmem:[%s2196_s11] ss:$0 sm:$0xff]  ;;  %s2137_s27 = scalar_lea.hbm %s2197_s12, %s1451_s18 }
 0x493   : > { %v1037_v44 = vpop.f32.mrb[14].mxu1 }
 0x494   : > { %v1552_v45 = vpop.f32.mrb[15].mxu1 }
 0x4f4   : > { %v1042_v46 = vpop.permute.xlu1 %1041 }
 0x4f5   : > { %v1052_v48 = vsel %vm610_vm2, %v707_v30, %v1042_v46 }
 0x4fc   : > { %v1046_v47 = vpop.permute.xlu1 %1045 }
 0x4fd   : > { %v1053_v49 = vsel %vm657_vm3, %v1052_v48, %v1046_v47 }
 0x504   : > { %v1050_v50 = vpop.permute.xlu1 %1049 }
 0x505   : > { %v1055_v51 = vsel %vm1054_vm4, %v1053_v49, %v1050_v50 }
 0x506   : > { %v1056_v52 = vadd.f32 %v1055_v51, %v2003_v8  ;;  %v1664_v8 = vld [vmem:[%s2193_s8] sm:$0xff]  }
 0x507   : > { %1562 = vmatpush3.bf16.msra.mxu1 %v1664_v8 }
 0x508   : > { %v1059_v53 = vsel %vm493_vm1, %v1056_v52, 0.0  ;;  %1563 = vmatprep.subr.bf16.mxu1 %v1807_v0 }
 0x509   : > { %1060 = vadd.xlane.f32.xlu1 %v1059_v53 }
 0x50b   : > { %1564 = vmatpush3.bf16.msra.mxu1 %v1665_v61 }
 0x50c   : > { %1565 = vmatprep.subr.bf16.mxu1 %v1807_v0 }
 0x50f   : > { %1566 = vmatpush3.bf16.msra.mxu1 %v1666_v62 }
 0x510   : > { %1567 = vmatprep.subr.bf16.mxu1 %v1807_v0 }
 0x513   : > { %1568 = vmatpush3.bf16.msra.mxu1 %v1667_v63 }
 0x514   : > { %1569 = vmatprep.subr.bf16.mxu1 %v1807_v0 }
 0x517   : > { %1570 = vmatpush3.bf16.msra.mxu1 %v1668_v1 }
 0x518   : > { %1571 = vmatprep.subr.bf16.mxu1 %v1807_v0 }
 0x51b   : > { %1572 = vmatpush3.bf16.msra.mxu1 %v1669_v2 }
 0x51c   : > { %1573 = vmatprep.subr.bf16.mxu1 %v1807_v0 }
 0x51f   : > { %1574 = vmatpush3.bf16.msra.mxu1 %v1670_v14 }
 0x520   : > { %1575 = vmatprep.subr.bf16.mxu1 %v1807_v0  ;;  %v1439_v0 = vld [vmem:[%s2194_s9] ss:$0 sm:$0xff] }
 0x523   : > { %1576 = vmatpush3.bf16.msra.mxu1 %v1671_v15 }
 0x596   : > { %v1061_v54 = vpop.xlane.xlu1 %1060 }
 0x597   : > { %v1063_v55 = vmul.f32 0.03125, %v1061_v54 }
 0x599   : > { %v1064_v56 = vsub.f32 %v1056_v52, %v1063_v55 }
 0x59b   : > { %v1065_v57 = vmul.f32 %v1064_v56, %v1064_v56 }
 0x59d   : > { %v1066_v58 = vsel %vm493_vm1, %v1065_v57, 0.0 }
 0x59e   : > { %1067 = vadd.xlane.f32.xlu0 %v1066_v58 }
 0x62b   : > { %v1068_v3 = vpop.xlane.xlu0 %1067 }
 0x62c   : > { %v1069_v4 = vmul.f32 0.03125, %v1068_v3 }
 0x62e   : > { %v1070_v5 = vadd.f32 1e-05, %v1069_v4 }
 0x630   : > { %1688 = vrsqrt.f32 %v1070_v5 }
 0x63a   : > { %v1689_v6 = vpop.eup %1688 }
 0x63b   : > { %v1072_v9 = vmul.f32 %v1689_v6, %v1064_v56 }
 0x63d   : > { %v1079_v11 = vmul.f32 %v1433_v7, %v1072_v9 }
 0x63f   : > { %v1086_v12 = vadd.f32 %v1434_v10, %v1079_v11 }
 0x641   : > { %v1087_v13 = vpack.c.bf16 %v1086_v12, %v1086_v12 }
 0x643   : > { %1558 = vmatmul.mubr.msk.bf16.vlgmr.msra.gmra.mrb[24].mxu0 %vm493_vm1, %v1087_v13 }
 0x716   : > { %v1148_v17 = vpop.f32.mrb[24].mxu0 }
 0x717   : > { %v1149_v18 = vadd.f32 %v1435_v16, %v1148_v17  ;;  %v1559_v19 = vpop.f32.mrb[25].mxu0 }
 0x718   : > { %v1151_v20 = vpop.f32.mrb[26].mxu0 }
 0x719   : > { %v1154_v21 = vmax.f32 %v1149_v18, 0.0  ;;  %v1560_v22 = vpop.f32.mrb[27].mxu0 }
 0x71b   : > { %v1155_v23 = vpack.c.bf16 %v1154_v21, %v1154_v21 }
 0x71d   : > { %1578 = vmatmul.mubr.bf16.vlgmr.msra.gmra.mrb[16].mxu1 %v1155_v23 }
 0x7f0   : > { %v1261_v24 = vpop.f32.mrb[16].mxu1 }
 0x7f1   : > { %v1262_v25 = vadd.f32 %v1439_v0, %v1261_v24  ;;  %v1579_v26 = vpop.f32.mrb[17].mxu1 }
 0x7f2   : > { %v1264_v27 = vpop.f32.mrb[18].mxu1 }
 0x7f3   : > { %v1580_v28 = vpop.f32.mrb[19].mxu1  ;;  %v1267_v29 = vadd.f32 %v1262_v25, %v1086_v12 }
 0x7f5   : > { %v1270_v30 = vsel %vm493_vm1, %v1267_v29, 0.0 }
 0x7f6   : > { %1271 = vadd.xlane.f32.xlu0 %v1270_v30 }
 0x883   : > { %v1272_v31 = vpop.xlane.xlu0 %1271 }
 0x884   : > { %v1273_v32 = vmul.f32 0.03125, %v1272_v31 }
 0x886   : > { %v1274_v33 = vsub.f32 %v1267_v29, %v1273_v32 }
 0x888   : > { %v1275_v34 = vmul.f32 %v1274_v33, %v1274_v33 }
 0x88a   : > { %v1276_v35 = vsel %vm493_vm1, %v1275_v34, 0.0 }
 0x88b   : > { %1277 = vadd.xlane.f32.xlu1 %v1276_v35 }
 0x918   : > { %v1278_v36 = vpop.xlane.xlu1 %1277 }
 0x919   : > { %v1279_v37 = vmul.f32 0.03125, %v1278_v36 }
 0x91b   : > { %v1280_v38 = vadd.f32 1e-05, %v1279_v37 }
 0x91d   : > { %1690 = vrsqrt.f32 %v1280_v38 }
 0x927   : > { %v1691_v39 = vpop.eup %1690 }
 0x928   : > { %v1282_v41 = vmul.f32 %v1691_v39, %v1274_v33 }
 0x92a   : > { %v1289_v43 = vmul.f32 %v1448_v40, %v1282_v41 }
 0x92c   : > { %v1296_v44 = vadd.f32 %v1449_v42, %v1289_v43 }
 0x92e   : > { %1297 = vst.msk [vmem:[%s456_s19] sm:$0xff] %vm493_vm1, %v1296_v44 }
 0x92f   : > { %1733 = shalt.err (!%p1730_p6)
}
 0x930   : > { %s1734_s29 = scalar_lea.hbm %s2137_s27, 128  ;;  %s1738_s19 = scalar_lea.hbm %s2197_s12, 256 }
 0x931   : > { %p1735_p7 = scmp.ne.s32.totalorder %s2137_s27, %s1734_s29  ;;  %p1739_p0 = scmp.lt.u32.totalorder %s2137_s27, %s2197_s12 }
 0x932   : > { %p1740_p2 = scmp.lt.u32.totalorder %s1738_s19, %s1734_s29  ;;  %p1742_p8 = scmp.lt.u32.totalorder %s1734_s29, %s2137_s27 }
 0x933   : > { %p1736_p9 = pnand %p1735_p7, %p2216_p10 }
 0x934   : > { %p1741_p4 = por %p1740_p2, %p1739_p0 }
 0x935   : > { %p1737_p12 = pneg %p1736_p9 }
 0x936   : > { %p1743_p11 = por %p1742_p8, %p1741_p4 }
 0x938   : > { %p1744_p13 = pnand %p1743_p11, %p1737_p12 }
 0x93a   : > { %1747 = shalt.err (!%p1744_p13)
}
 0x93b   : > { %1585 = dma.vmem_to_hbm [thread:$0]  (%p2216_p10), %s2139_s25, 128, %s2137_s27, %s1299_s17  }
 0x93c PF: > { %p1597_p1 = scmp.ge.s32.totalorder %s1802_s26, 2  ;;  %s1325_s20 = sand.u32 1, %s1782_s21  }
 0x93d   : > { %p2217_p3 = scmp.ne.s32.totalorder %s2209_s15, 0  ;;  %s1326_s24 = scalar_lea.sflag [#allocation6], %s1325_s20 }
 0x93f   : > { %p1592_p5 = pnand %p1597_p1, %p2217_p3 }
 0x941   : > { %1777 = dma.done.wait (!%p1592_p5), %s1326_s24, 128  }
 0x942   : > { %1779 = vsyncadd (!%p1592_p5), %s1326_s24, 4294967168  ;;  %s26_s26 = sadd.s32 1, %s1802_s26   ;;  %s2218_s16 = sld [smem:[#allocation10_spill]] }
 0x943   : > { %p23_p6 = scmp.ge.s32.totalorder %s26_s26, 4   ;;  %s2219_s23 = sld [smem:[#allocation13_spill]] }
 0x944   : > { %s2220_s24 = sld [smem:[#allocation11_spill]]  ;;  %s2221_s25 = sld [smem:[#allocation12_spill]] }
 0x945   : > { %s2222_s21 = smov %s1786_s22  ;;  %25 = sbr.rel (!%p23_p6) target bundleno = 5 (0x5), region = 115 }
 0x948   : > { %s2223_s22 = smov %s2218_s16 }
 0x94c   :  { %1331 = vsyncpa [#allocation5], 1 }
 0x94d   :  { %1333 = vsyncpa [#allocation5 + $0x1], 1 }
 0x94e   :  { %1334 = vsyncpa [#allocation6], 1 }
 0x94f   :  { %1336 = vsyncpa [#allocation6 + $0x1], 1 }

</bundles_post_ra>
